<compile_context>
chip_gen: v7x
topology: tpu7x:2x2x1
jax: 0.10.0
libtpu: 0.0.40
codegen_flags: <defaults>
</compile_context>

<pallas_src>
import jax
import jax.numpy as jnp
from jax.experimental import pallas as pl
from jax.experimental.pallas import tpu as pltpu


# ---------------------------------------------------------------------------
# Kernel
# ---------------------------------------------------------------------------
def _critic_kernel(x_ref,
                   w1_ref, b1_ref,
                   w2_ref, b2_ref,
                   w3_ref, b3_ref,
                   w4_ref, b4_ref,
                   q_ref):
    # fc1 over the merged [x, action/max_action] input (single MXU matmul).
    h = jnp.dot(x_ref[...], w1_ref[...], preferred_element_type=jnp.float32)
    h = jnp.maximum(h + b1_ref[...], 0.0)

    # fc2 + relu
    h = jnp.dot(h.astype(jnp.bfloat16), w2_ref[...],
                preferred_element_type=jnp.float32)
    h = jnp.maximum(h + b2_ref[...], 0.0)

    # fc3 + relu
    h = jnp.dot(h.astype(jnp.bfloat16), w3_ref[...],
                preferred_element_type=jnp.float32)
    h = jnp.maximum(h + b3_ref[...], 0.0)

    # fc4 (256 -> 1): VPU multiply by the (1, 256) weight row + lane reduce on the XLU.
    q = jnp.sum(h * w4_ref[...], axis=-1, keepdims=True) + b4_ref[0, 0]
    q_ref[...] = q.astype(q_ref.dtype)


# ---------------------------------------------------------------------------
# Parameter prep (layout + dtype transforms, done once outside the hot path)
# ---------------------------------------------------------------------------
def prepare_params(params, max_action):
    """Merge fc1 into one weight (1/max_action folded into the action rows), pad its
    in-dim to a bf16-friendly multiple of 16, cast weights to bf16, reshape biases
    defensively (handles 1-D PyTorch-style biases), and lay fc4 out as a (1, hidden)
    VPU row with an SMEM scalar bias."""
    w1x, w1a, b1, w2, b2, w3, b3, w4, b4 = params

    # Merged fc1 weight with the action scale folded in.
    w1 = jnp.concatenate([w1x, w1a / max_action], axis=0)       # (in_x + act, hidden)
    in_total = w1.shape[0]
    in_pad = ((in_total + 15) // 16) * 16                       # bf16 sublane multiple
    if in_pad != in_total:
        w1 = jnp.pad(w1, ((0, in_pad - in_total), (0, 0)))

    def _row(b):   # (hidden,) or (1, hidden) -> (1, hidden) f32
        return jnp.asarray(b, jnp.float32).reshape(1, -1)

    return (w1.astype(jnp.bfloat16),
            _row(b1),
            jnp.asarray(w2, jnp.bfloat16),
            _row(b2),
            jnp.asarray(w3, jnp.bfloat16),
            _row(b3),
            jnp.asarray(w4, jnp.float32).reshape(1, -1),        # (1, hidden), VPU row
            jnp.asarray(b4, jnp.float32).reshape(1, 1))         # scalar, lives in SMEM


# ---------------------------------------------------------------------------
# Batch tiling selection
# ---------------------------------------------------------------------------
def _pick_batch_tiling(B, tb_max):
    """Return (padded_batch, batch_tile).

    * Pads the batch only to a 16-row multiple (bf16 sublane packing) when it fits in
      one or two tiles -> no wasteful full-tile pad for small/inference batches.
    * Splits into 2+ tiles when possible so the "parallel" batch axis can be sharded
      across v7x's 2 TensorCores.
    * For large batches, prefers a tile that divides the (lightly padded) batch; only
      falls back to padding up to a tb_max multiple if no decent divisor exists.
    """
    tb_max = max(16, (tb_max // 16) * 16)
    bp = -(-B // 16) * 16
    if bp <= tb_max:
        if bp >= 256 and bp % 32 == 0:       # 2 tiles -> both v7x TCs get work
            return bp, bp // 2
        return bp, bp
    t = tb_max
    while t >= 128:                          # largest 16-multiple tile dividing bp
        if bp % t == 0:
            return bp, t
        t -= 16
    bp = -(-B // tb_max) * tb_max            # fallback: pad to a tile multiple
    return bp, tb_max


# ---------------------------------------------------------------------------
# Host wrapper
# ---------------------------------------------------------------------------
def critic_forward(x, action, prepared, *, tb=1024):
    """x: (B, obs_dim + goal_dim), action: (B, action_dim) -> q: (B, 1) float32.

    tb is the max batch tile. 512-2048 keeps per-step overhead negligible while the
    grid retains >=2 steps for typical training batches (v7x megacore). VMEM use is
    ~6 KiB per tile row, so tb=2048 fits comfortably under v7x's 64 MiB/TC.
    """
    w1, b1, w2, b2, w3, b3, w4, b4 = prepared
    B = x.shape[0]
    in_pad = w1.shape[0]
    hidden = w2.shape[0]

    # Merge + pad features once (zero columns match the zero-padded weight rows).
    xin = jnp.concatenate([x, action], axis=1)
    if xin.shape[1] != in_pad:
        xin = jnp.pad(xin, ((0, 0), (0, in_pad - xin.shape[1])))
    xin = xin.astype(jnp.bfloat16)

    bp, tb_eff = _pick_batch_tiling(B, tb)
    if bp != B:
        xin = jnp.pad(xin, ((0, bp - B), (0, 0)))

    grid = (bp // tb_eff,)
    const2 = lambda i: (0, 0)          # weights/biases: same block every grid step

    in_specs = [
        pl.BlockSpec((tb_eff, in_pad), lambda i: (i, 0)),       # merged input tile
        pl.BlockSpec(w1.shape, const2),
        pl.BlockSpec(b1.shape, const2),
        pl.BlockSpec(w2.shape, const2),
        pl.BlockSpec(b2.shape, const2),
        pl.BlockSpec(w3.shape, const2),
        pl.BlockSpec(b3.shape, const2),
        pl.BlockSpec(w4.shape, const2),
        pl.BlockSpec(memory_space=pltpu.MemorySpace.SMEM),      # b4 scalar
    ]
    out_spec = pl.BlockSpec((tb_eff, 1), lambda i: (i, 0))

    # Advisory cost estimate for the XLA scheduler.
    flops = 2 * bp * (in_pad * hidden + 2 * hidden * hidden + hidden)
    weight_bytes = sum(int(a.size) * a.dtype.itemsize
                       for a in (w1, b1, w2, b2, w3, b3, w4, b4))
    bytes_accessed = weight_bytes + bp * in_pad * 2 + bp * 4
    cost = pl.CostEstimate(flops=flops, transcendentals=0,
                           bytes_accessed=bytes_accessed)

    # Explicit VMEM limit: ~6 KiB/row covers activations + double-buffered tiles;
    # cap at 56 MiB to stay within v7x's 64 MiB/TC (also raises v5e's 16 MiB default).
    vmem_bytes = min(56 << 20, int(2 * weight_bytes + tb_eff * (6 << 10) + (8 << 20)))

    q = pl.pallas_call(
        _critic_kernel,
        out_shape=jax.ShapeDtypeStruct((bp, 1), jnp.float32),
        grid=grid,
        in_specs=in_specs,
        out_specs=out_spec,
        compiler_params=pltpu.CompilerParams(
            dimension_semantics=("parallel",),
            vmem_limit_bytes=vmem_bytes),
        cost_estimate=cost,
    )(xin, w1, b1, w2, b2, w3, b3, w4, b4)

    return q[:B]


# ---------------------------------------------------------------------------
# Synthetic params + references
# ---------------------------------------------------------------------------
def init_params(key, in_x_dim, action_dim, hidden=256):
    """Deterministic synthetic parameters (f32). Weights stored (in, out)."""
    ks = jax.random.split(key, 8)
    scale = 0.1
    w1x = scale * jax.random.normal(ks[0], (in_x_dim, hidden), jnp.float32)
    w1a = scale * jax.random.normal(ks[1], (action_dim, hidden), jnp.float32)
    b1 = scale * jax.random.normal(ks[2], (hidden,), jnp.float32)      # 1-D on purpose
    w2 = scale * jax.random.normal(ks[3], (hidden, hidden), jnp.float32)
    b2 = scale * jax.random.normal(ks[4], (hidden,), jnp.float32)
    w3 = scale * jax.random.normal(ks[5], (hidden, hidden), jnp.float32)
    b3 = scale * jax.random.normal(ks[6], (hidden,), jnp.float32)
    w4 = scale * jax.random.normal(ks[7], (hidden, 1), jnp.float32)
    b4 = scale * jax.random.normal(jax.random.fold_in(key, 99), (1,), jnp.float32)
    return (w1x, w1a, b1, w2, b2, w3, b3, w4, b4)


def critic_reference_f32(x, action, params, max_action):
    """Pure-JAX f32 reference matching the PyTorch forward (the spec)."""
    w1x, w1a, b1, w2, b2, w3, b3, w4, b4 = params
    xin = jnp.concatenate([x, action / max_action], axis=1)
    w1 = jnp.concatenate([w1x, w1a], axis=0)
    h = jax.nn.relu(xin @ w1 + b1.reshape(1, -1))
    h = jax.nn.relu(h @ w2 + b2.reshape(1, -1))
    h = jax.nn.relu(h @ w3 + b3.reshape(1, -1))
    return h @ w4 + b4.reshape(1, 1)


def critic_reference_bf16(x, action, prepared):
    """Reference with the same merged-fc1, bf16-input / f32-accumulate arithmetic."""
    w1, b1, w2, b2, w3, b3, w4, b4 = prepared
    xin = jnp.concatenate([x, action], axis=1)
    xin = jnp.pad(xin, ((0, 0), (0, w1.shape[0] - xin.shape[1]))).astype(jnp.bfloat16)
    h = jax.nn.relu(jnp.dot(xin, w1, preferred_element_type=jnp.float32) + b1)
    h = jax.nn.relu(jnp.dot(h.astype(jnp.bfloat16), w2,
                            preferred_element_type=jnp.float32) + b2)
    h = jax.nn.relu(jnp.dot(h.astype(jnp.bfloat16), w3,
                            preferred_element_type=jnp.float32) + b3)
    return jnp.sum(h * w4, axis=-1, keepdims=True) + b4[0, 0]


# ---------------------------------------------------------------------------
# Demo / self-test
# ---------------------------------------------------------------------------
if __name__ == "__main__":
    # Small env_params consistent with the module (her=True branch).
    obs_dim, goal_dim, action_dim = 10, 5, 4
    max_action = 2.0
    batch = 8
    in_x_dim = obs_dim + goal_dim  # x already holds [obs, goal], as in HER usage

    key = jax.random.PRNGKey(0)
    k_x, k_a, k_p = jax.random.split(key, 3)

    x = jax.random.normal(k_x, (batch, in_x_dim), jnp.float32)
    action = max_action * jax.random.uniform(k_a, (batch, action_dim), jnp.float32,
                                             minval=-1.0, maxval=1.0)
    params = init_params(k_p, in_x_dim, action_dim, hidden=256)
    prepared = prepare_params(params, max_action)

    q = critic_forward(x, action, prepared, tb=1024)
    q = jax.block_until_ready(q)
    assert q.shape == (batch, 1)

    # Tight check: same bf16/f32-accumulate arithmetic as the kernel.
    q_bf16 = critic_reference_bf16(x, action, prepared)
    assert jnp.allclose(q, q_bf16, atol=1e-3, rtol=1e-3), "mismatch vs bf16 reference"

    # Loose check: full-precision spec semantics (bf16 weight quantization tolerance).
    q_f32 = critic_reference_f32(x, action, params, max_action)
    assert jnp.allclose(q, q_f32, atol=5e-2, rtol=5e-2), "mismatch vs f32 reference"

    # Secondary check with a batch that exercises multi-tile + ragged-batch handling.
    batch2 = 300
    x2 = jax.random.normal(jax.random.fold_in(key, 1), (batch2, in_x_dim), jnp.float32)
    a2 = max_action * jax.random.uniform(jax.random.fold_in(key, 2),
                                         (batch2, action_dim), jnp.float32,
                                         minval=-1.0, maxval=1.0)
    q2 = jax.block_until_ready(critic_forward(x2, a2, prepared, tb=128))
    q2_ref = critic_reference_bf16(x2, a2, prepared)
    assert q2.shape == (batch2, 1)
    assert jnp.allclose(q2, q2_ref, atol=1e-3, rtol=1e-3), "multi-tile mismatch"

    print("KERNEL_OK")
</pallas_src>

<mosaic_0001>
module attributes {stable_mosaic.version = 11 : i64} {
  func.func @_critic_kernel(%arg0: i32, %arg1: memref<16x32xbf16, #tpu.memory_space<vmem>>, %arg2: memref<32x256xbf16, #tpu.memory_space<vmem>>, %arg3: memref<1x256xf32, #tpu.memory_space<vmem>>, %arg4: memref<256x256xbf16, #tpu.memory_space<vmem>>, %arg5: memref<1x256xf32, #tpu.memory_space<vmem>>, %arg6: memref<256x256xbf16, #tpu.memory_space<vmem>>, %arg7: memref<1x256xf32, #tpu.memory_space<vmem>>, %arg8: memref<1x256xf32, #tpu.memory_space<vmem>>, %arg9: memref<1x1xf32, #tpu.memory_space<smem>>, %arg10: memref<16x1xf32, #tpu.memory_space<vmem>>) attributes {dimension_semantics = [#tpu.dimension_semantics<parallel>], iteration_bounds = array<i64: 1>, scalar_prefetch = 0 : i64, scratch_operands = 0 : i64, tpu.core_type = #tpu.core_type<tc>, window_params = [{transform_indices = @transform_0, window_bounds = array<i64: 16, 32>}, {pipeline_mode = #tpu.pipeline_mode<synchronous>, transform_indices = @transform_1, window_bounds = array<i64: 32, 256>}, {pipeline_mode = #tpu.pipeline_mode<synchronous>, transform_indices = @transform_2, window_bounds = array<i64: 1, 256>}, {pipeline_mode = #tpu.pipeline_mode<synchronous>, transform_indices = @transform_3, window_bounds = array<i64: 256, 256>}, {pipeline_mode = #tpu.pipeline_mode<synchronous>, transform_indices = @transform_4, window_bounds = array<i64: 1, 256>}, {pipeline_mode = #tpu.pipeline_mode<synchronous>, transform_indices = @transform_5, window_bounds = array<i64: 256, 256>}, {pipeline_mode = #tpu.pipeline_mode<synchronous>, transform_indices = @transform_6, window_bounds = array<i64: 1, 256>}, {pipeline_mode = #tpu.pipeline_mode<synchronous>, transform_indices = @transform_7, window_bounds = array<i64: 1, 256>}, {transform_indices = @transform_8, window_bounds = array<i64: 1, 1>}, {transform_indices = @transform_9, window_bounds = array<i64: 16, 1>}]} {
    %c0 = arith.constant 0 : index
    %c0_0 = arith.constant 0 : index
    %0 = vector.load %arg1[%c0, %c0_0] : memref<16x32xbf16, #tpu.memory_space<vmem>>, vector<16x32xbf16>
    %c0_1 = arith.constant 0 : index
    %c0_2 = arith.constant 0 : index
    %1 = vector.load %arg2[%c0_1, %c0_2] : memref<32x256xbf16, #tpu.memory_space<vmem>>, vector<32x256xbf16>
    %cst = arith.constant dense<0.000000e+00> : vector<16x256xf32>
    %2 = tpu.matmul %0, %1, %cst {dimension_numbers = #tpu.dot_dimension_numbers<[1], [0], [0], [1], [0, 0, 1, 1], [], []>} : vector<16x32xbf16>, vector<32x256xbf16>, vector<16x256xf32> -> vector<16x256xf32>
    %c0_3 = arith.constant 0 : index
    %c0_4 = arith.constant 0 : index
    %3 = vector.load %arg3[%c0_3, %c0_4] : memref<1x256xf32, #tpu.memory_space<vmem>>, vector<1x256xf32>
    %4 = vector.broadcast %3 : vector<1x256xf32> to vector<16x256xf32>
    %5 = arith.addf %2, %4 : vector<16x256xf32>
    %cst_5 = arith.constant 0.000000e+00 : f32
    %6 = vector.broadcast %cst_5 : f32 to vector<16x256xf32>
    %7 = arith.maximumf %5, %6 : vector<16x256xf32>
    %8 = arith.truncf %7 : vector<16x256xf32> to vector<16x256xbf16>
    %c0_6 = arith.constant 0 : index
    %c0_7 = arith.constant 0 : index
    %9 = vector.load %arg4[%c0_6, %c0_7] : memref<256x256xbf16, #tpu.memory_space<vmem>>, vector<256x256xbf16>
    %cst_8 = arith.constant dense<0.000000e+00> : vector<16x256xf32>
    %10 = tpu.matmul %8, %9, %cst_8 {dimension_numbers = #tpu.dot_dimension_numbers<[1], [0], [0], [1], [0, 0, 1, 1], [], []>} : vector<16x256xbf16>, vector<256x256xbf16>, vector<16x256xf32> -> vector<16x256xf32>
    %c0_9 = arith.constant 0 : index
    %c0_10 = arith.constant 0 : index
    %11 = vector.load %arg5[%c0_9, %c0_10] : memref<1x256xf32, #tpu.memory_space<vmem>>, vector<1x256xf32>
    %12 = vector.broadcast %11 : vector<1x256xf32> to vector<16x256xf32>
    %13 = arith.addf %10, %12 : vector<16x256xf32>
    %cst_11 = arith.constant 0.000000e+00 : f32
    %14 = vector.broadcast %cst_11 : f32 to vector<16x256xf32>
    %15 = arith.maximumf %13, %14 : vector<16x256xf32>
    %16 = arith.truncf %15 : vector<16x256xf32> to vector<16x256xbf16>
    %c0_12 = arith.constant 0 : index
    %c0_13 = arith.constant 0 : index
    %17 = vector.load %arg6[%c0_12, %c0_13] : memref<256x256xbf16, #tpu.memory_space<vmem>>, vector<256x256xbf16>
    %cst_14 = arith.constant dense<0.000000e+00> : vector<16x256xf32>
    %18 = tpu.matmul %16, %17, %cst_14 {dimension_numbers = #tpu.dot_dimension_numbers<[1], [0], [0], [1], [0, 0, 1, 1], [], []>} : vector<16x256xbf16>, vector<256x256xbf16>, vector<16x256xf32> -> vector<16x256xf32>
    %c0_15 = arith.constant 0 : index
    %c0_16 = arith.constant 0 : index
    %19 = vector.load %arg7[%c0_15, %c0_16] : memref<1x256xf32, #tpu.memory_space<vmem>>, vector<1x256xf32>
    %20 = vector.broadcast %19 : vector<1x256xf32> to vector<16x256xf32>
    %21 = arith.addf %18, %20 : vector<16x256xf32>
    %cst_17 = arith.constant 0.000000e+00 : f32
    %22 = vector.broadcast %cst_17 : f32 to vector<16x256xf32>
    %23 = arith.maximumf %21, %22 : vector<16x256xf32>
    %c0_18 = arith.constant 0 : index
    %c0_19 = arith.constant 0 : index
    %24 = vector.load %arg8[%c0_18, %c0_19] : memref<1x256xf32, #tpu.memory_space<vmem>>, vector<1x256xf32>
    %25 = vector.broadcast %24 : vector<1x256xf32> to vector<16x256xf32>
    %26 = arith.mulf %23, %25 : vector<16x256xf32>
    %cst_20 = arith.constant dense<0.000000e+00> : vector<16xf32>
    %27 = vector.multi_reduction <add>, %26, %cst_20 [1] : vector<16x256xf32> to vector<16xf32>
    %28 = vector.shape_cast %27 : vector<16xf32> to vector<16x1xf32>
    %c0_21 = arith.constant 0 : index
    %c0_22 = arith.constant 0 : index
    %29 = memref.load %arg9[%c0_21, %c0_22] : memref<1x1xf32, #tpu.memory_space<smem>>
    %30 = vector.broadcast %29 : f32 to vector<16x1xf32>
    %31 = arith.addf %28, %30 : vector<16x1xf32>
    %c0_23 = arith.constant 0 : index
    %c0_24 = arith.constant 0 : index
    %32 = vector.load %arg10[%c0_23, %c0_24] : memref<16x1xf32, #tpu.memory_space<vmem>>, vector<16x1xf32>
    tpu.vector_store %arg10[%c0_23, %c0_24], %31 {strides = array<i32>} : memref<16x1xf32, #tpu.memory_space<vmem>>, vector<16x1xf32>,
    return
  }
  func.func @transform_0(%arg0: i32) -> (i32, i32) {
    %c0_i32 = arith.constant 0 : i32
    %c0_i32_0 = arith.constant 0 : i32
    return %arg0, %c0_i32 : i32, i32
  }
  func.func @transform_1(%arg0: i32) -> (i32, i32) {
    %c0_i32 = arith.constant 0 : i32
    %c0_i32_0 = arith.constant 0 : i32
    %c0_i32_1 = arith.constant 0 : i32
    return %c0_i32, %c0_i32_0 : i32, i32
  }
  func.func @transform_2(%arg0: i32) -> (i32, i32) {
    %c0_i32 = arith.constant 0 : i32
    %c0_i32_0 = arith.constant 0 : i32
    %c0_i32_1 = arith.constant 0 : i32
    return %c0_i32, %c0_i32_0 : i32, i32
  }
  func.func @transform_3(%arg0: i32) -> (i32, i32) {
    %c0_i32 = arith.constant 0 : i32
    %c0_i32_0 = arith.constant 0 : i32
    %c0_i32_1 = arith.constant 0 : i32
    return %c0_i32, %c0_i32_0 : i32, i32
  }
  func.func @transform_4(%arg0: i32) -> (i32, i32) {
    %c0_i32 = arith.constant 0 : i32
    %c0_i32_0 = arith.constant 0 : i32
    %c0_i32_1 = arith.constant 0 : i32
    return %c0_i32, %c0_i32_0 : i32, i32
  }
  func.func @transform_5(%arg0: i32) -> (i32, i32) {
    %c0_i32 = arith.constant 0 : i32
    %c0_i32_0 = arith.constant 0 : i32
    %c0_i32_1 = arith.constant 0 : i32
    return %c0_i32, %c0_i32_0 : i32, i32
  }
  func.func @transform_6(%arg0: i32) -> (i32, i32) {
    %c0_i32 = arith.constant 0 : i32
    %c0_i32_0 = arith.constant 0 : i32
    %c0_i32_1 = arith.constant 0 : i32
    return %c0_i32, %c0_i32_0 : i32, i32
  }
  func.func @transform_7(%arg0: i32) -> (i32, i32) {
    %c0_i32 = arith.constant 0 : i32
    %c0_i32_0 = arith.constant 0 : i32
    %c0_i32_1 = arith.constant 0 : i32
    return %c0_i32, %c0_i32_0 : i32, i32
  }
  func.func @transform_8(%arg0: i32) -> (i32, i32) {
    %c0_i32 = arith.constant 0 : i32
    %c0_i32_0 = arith.constant 0 : i32
    %c0_i32_1 = arith.constant 0 : i32
    return %c0_i32, %c0_i32_0 : i32, i32
  }
  func.func @transform_9(%arg0: i32) -> (i32, i32) {
    %c0_i32 = arith.constant 0 : i32
    %c0_i32_0 = arith.constant 0 : i32
    return %arg0, %c0_i32 : i32, i32
  }
}

</mosaic_0001>

<bundles_post_ra>
// kernel: tpu_custom_call.1
= control target key start
LH: loop header
LB: loop body
LE: loop exit
PB: predicated region body
PF: predicated region fallthrough
CT: control target
= control target key end

     0   :  { %15 = vsyncpa [#allocation4], 0  ;;  %s1145_s0 = inlined_call_operand.hbm [shape: bf16[16,32], index: 0, kind: input, shape index: {}]   ;;  %s1146_s1 = inlined_call_operand.hbm [shape: bf16[32,256], index: 1, kind: input, shape index: {}]   ;;  %s1147_s2 = inlined_call_operand.vmem [shape: f32[1,256], index: 2, kind: input, shape index: {}]   ;;  %s1148_s3 = inlined_call_operand.hbm [shape: bf16[256,256], index: 3, kind: input, shape index: {}]   ;;  %s1149_s4 = inlined_call_operand.vmem [shape: f32[1,256], index: 4, kind: input, shape index: {}]   ;;  %s1150_s5 = inlined_call_operand.hbm [shape: bf16[256,256], index: 5, kind: input, shape index: {}]   ;;  %s1151_s6 = inlined_call_operand.vmem [shape: f32[1,256], index: 6, kind: input, shape index: {}]   ;;  %s1152_s7 = inlined_call_operand.vmem [shape: f32[1,256], index: 7, kind: input, shape index: {}]   ;;  %s1153_s8 = inlined_call_operand.<no memory space> [shape: f32[1,1], index: 8, kind: input, shape index: {}]   ;;  %s1154_s9 = inlined_call_operand.vmem [shape: f32[16,1], index: 9, kind: output, shape index: {}]  }
   0x1   :  { %16 = vsyncpa [#allocation6], 0 }
   0x2   :  { %17 = vsyncpa [#allocation9], 0  ;;  %s1001_s30 = smov [#allocation5]   ;;  %s907_s13 = scalar_lea.hbm %s1146_s1, 512 }
   0x3   :  { %s35_s10 = sshll.u32 %s1001_s30, 4  ;;  %p908_p0 = scmp.ne.s32.totalorder %s1146_s1, %s907_s13  ;;  %s36_s10 = int_to_ptr.vmem [resolvable:$true] %s35_s10 }
   0x4   :  { %p911_p1 = scmp.lt.u32.totalorder %s907_s13, %s1146_s1 }
   0x6   :  { %p913_p2 = pnand %p911_p1, %p908_p0 }
   0x8   :  { %916 = shalt.err (!%p913_p2)
}
   0x9   :  { %s917_s18 = scalar_lea.vmem %s36_s10, 512  ;;  %p922_p4 = scmp.lt.s32.totalorder %s36_s10, %s36_s10 }
   0xa   :  { %p918_p3 = scmp.ne.s32.totalorder %s36_s10, %s917_s18  ;;  %p923_p5 = scmp.lt.s32.totalorder %s917_s18, %s917_s18 }
   0xc   :  { %p924_p6 = por %p923_p5, %p922_p4 }
   0xe   :  { %p925_p7 = pnand %p924_p6, %p918_p3 }
  0x10   :  { %928 = shalt.err (!%p925_p7)
}
  0x11   :  { %s1002_s19 = smov 128   ;;  %s1003_s20 = smov 8  }
  0x12   :  { %41 = dma.hbm_to_vmem [thread:$0]  %s1146_s1, 512, %s36_s10, [#allocation6], %s1002_s19, %s1002_s19, %s1003_s20  }
  0x13   :  { %s1004_s23 = smov [#allocation3]   ;;  %s929_s27 = scalar_lea.hbm %s1145_s0, 128 }
  0x14   :  { %s23_s24 = sshll.u32 %s1004_s23, 4  ;;  %p930_p8 = scmp.ne.s32.totalorder %s1145_s0, %s929_s27  ;;  %s24_s24 = int_to_ptr.vmem [resolvable:$true] %s23_s24 }
  0x15   :  { %p933_p9 = scmp.lt.u32.totalorder %s929_s27, %s1145_s0 }
  0x17   :  { %p935_p10 = pnand %p933_p9, %p930_p8 }
  0x19   :  { %938 = shalt.err (!%p935_p10)
}
  0x1a   :  { %s939_s12 = scalar_lea.vmem %s24_s24, 128  ;;  %p944_p12 = scmp.lt.s32.totalorder %s24_s24, %s24_s24 }
  0x1b   :  { %p940_p11 = scmp.ne.s32.totalorder %s24_s24, %s939_s12  ;;  %p945_p13 = scmp.lt.s32.totalorder %s939_s12, %s939_s12 }
  0x1d   :  { %p946_p0 = por %p945_p13, %p944_p12 }
  0x1f   :  { %p947_p1 = pnand %p946_p0, %p940_p11 }
  0x21   :  { %950 = shalt.err (!%p947_p1)
}
  0x22   :  { %s1005_s1 = smov 64   ;;  %s1006_s10 = smov 4  }
  0x23   :  { %29 = dma.hbm_to_vmem [thread:$0]  %s1145_s0, 128, %s24_s24, [#allocation4], %s1005_s1, %s1005_s1, %s1006_s10  }
  0x24   :  { %s1007_s15 = smov [#allocation7]   ;;  %s1008_s17 = smov [#allocation8]  }
  0x25   :  { %s49_s16 = sshll.u32 %s1007_s15, 4  ;;  %s63_s18 = sshll.u32 %s1008_s17, 4  ;;  %s50_s16 = int_to_ptr.vmem [resolvable:$true] %s49_s16  ;;  %s1087_s18 = int_to_ptr.vmem [resolvable:$true] %s63_s18 }
  0x26   :  { %s951_s23 = scalar_lea.hbm %s1148_s3, 4096 }
  0x27   :  { %p952_p2 = scmp.ne.s32.totalorder %s1148_s3, %s951_s23  ;;  %p955_p3 = scmp.lt.u32.totalorder %s951_s23, %s1148_s3 }
  0x29   :  { %p957_p4 = pnand %p955_p3, %p952_p2 }
  0x2b   :  { %960 = shalt.err (!%p957_p4)
}
  0x2c   :  { %s961_s0 = scalar_lea.vmem %s50_s16, 4096  ;;  %p966_p6 = scmp.lt.s32.totalorder %s50_s16, %s50_s16 }
  0x2d   :  { %p962_p5 = scmp.ne.s32.totalorder %s50_s16, %s961_s0  ;;  %p967_p7 = scmp.lt.s32.totalorder %s961_s0, %s961_s0 }
  0x2f   :  { %p968_p8 = por %p967_p7, %p966_p6 }
  0x31   :  { %p969_p9 = pnand %p968_p8, %p962_p5 }
  0x33   :  { %972 = shalt.err (!%p969_p9)
}
  0x34   :  { %55 = dma.hbm_to_vmem [thread:$0]  %s1148_s3, 4096, %s50_s16, [#allocation6], %s1002_s19, %s1002_s19, %s1003_s20  }
  0x35   :  { %s973_s12 = scalar_lea.hbm %s1150_s5, 4096 }
  0x36   :  { %p974_p10 = scmp.ne.s32.totalorder %s1150_s5, %s973_s12  ;;  %p977_p11 = scmp.lt.u32.totalorder %s973_s12, %s1150_s5 }
  0x38   :  { %p979_p12 = pnand %p977_p11, %p974_p10 }
  0x3a   :  { %982 = shalt.err (!%p979_p12)
}
  0x3b   :  { %s983_s15 = scalar_lea.vmem %s1087_s18, 4096  ;;  %p988_p0 = scmp.lt.s32.totalorder %s1087_s18, %s1087_s18 }
  0x3c   :  { %p984_p13 = scmp.ne.s32.totalorder %s1087_s18, %s983_s15  ;;  %p989_p1 = scmp.lt.s32.totalorder %s983_s15, %s983_s15 }
  0x3e   :  { %p990_p2 = por %p989_p1, %p988_p0 }
  0x40   :  { %p991_p3 = pnand %p990_p2, %p984_p13 }
  0x42   :  { %994 = shalt.err (!%p991_p3)
}
  0x43   :  { %69 = dma.hbm_to_vmem [thread:$0]  %s1150_s5, 4096, %s1087_s18, [#allocation9], %s1002_s19, %s1002_s19, %s1003_s20  }
  0x44   :  { %995 = dma.done.wait [#allocation4], 128  }
  0x45   :  { %996 = vsyncadd [#allocation4], 4294967168 }
  0x46   :  { %997 = dma.done.wait [#allocation6], 4608  }
  0x47   :  { %998 = vsyncadd [#allocation6], 4294962688 }
  0x48   :  { %999 = dma.done.wait [#allocation9], 4096  }
  0x49   :  { %1000 = vsyncadd [#allocation9], 4294963200  ;;  %v1009_v0 = vmov 0   ;;  %v804_v1 = vld [vmem:[#allocation5 + $0x4] ss:$8 sps:$4 sm:$0xff]   ;;  %v810_v8 = vld [vmem:[#allocation3] sm:$0xff]  }
  0x4a   :  { %168 = vmatprep.mubr.bf16.mxu0 %v1009_v0  ;;  %v806_v2 = vld [vmem:[#allocation5] ss:$8 sps:$4 sm:$0xff]   ;;  %136 = vmatprep.subr.bf16.mxu0 %v804_v1  ;;  %v807_v3 = vld [vmem:[#allocation5 + $0x14] ss:$8 sps:$4 sm:$0xff]   ;;  %v809_v4 = vld [vmem:[#allocation5 + $0x10] ss:$8 sps:$4 sm:$0xff]  }
  0x4b   :  { %137 = vmatpush1.bf16.msra.mxu0 %v806_v2  ;;  %v811_v5 = vld [vmem:[#allocation7 + $0x4] ss:$8 sps:$4 sm:$0xff]   ;;  %v813_v6 = vld [vmem:[#allocation7] ss:$8 sps:$4 sm:$0xff]   ;;  %v814_v7 = vld [vmem:[#allocation7 + $0x14] ss:$8 sps:$4 sm:$0xff]   ;;  %v97_v2 = vlaneseq }
  0x4c   :  { %138 = vmatprep.subr.bf16.mxu0 %v807_v3  ;;  %389 = vmatprep.subr.bf16.mxu1 %v811_v5  ;;  %vm132_vm0 = vcmask 261120   ;;  %v816_v9 = vld [vmem:[#allocation7 + $0x10] ss:$8 sps:$4 sm:$0xff]   ;;  %v817_v10 = vld [vmem:[#allocation7 + $0x24] ss:$8 sps:$4 sm:$0xff]   ;;  %vm715_vm1 = vcmask 7168  }
  0x4d   :  { %390 = vmatpush1.bf16.msra.mxu1 %v813_v6  ;;  %v819_v11 = vld [vmem:[#allocation7 + $0x20] ss:$8 sps:$4 sm:$0xff]   ;;  %v820_v12 = vld [vmem:[#allocation7 + $0x34] ss:$8 sps:$4 sm:$0xff]   ;;  %v822_v13 = vld [vmem:[#allocation7 + $0x30] ss:$8 sps:$4 sm:$0xff]  }
  0x4e   :  { %391 = vmatprep.subr.bf16.mxu1 %v814_v7  ;;  %v823_v14 = vld [vmem:[#allocation7 + $0x44] ss:$8 sps:$4 sm:$0xff]   ;;  %v825_v15 = vld [vmem:[#allocation7 + $0x40] ss:$8 sps:$4 sm:$0xff]   ;;  %v826_v16 = vld [vmem:[#allocation7 + $0x54] ss:$8 sps:$4 sm:$0xff]  }
  0x4f   :  { %139 = vmatpush1.bf16.msra.mxu0 %v809_v4  ;;  %v828_v17 = vld [vmem:[#allocation7 + $0x50] ss:$8 sps:$4 sm:$0xff]   ;;  %v829_v18 = vld [vmem:[#allocation7 + $0x64] ss:$8 sps:$4 sm:$0xff]   ;;  %v831_v19 = vld [vmem:[#allocation7 + $0x60] ss:$8 sps:$4 sm:$0xff]  }
  0x50   :  { %v832_v20 = vld [vmem:[#allocation7 + $0x74] ss:$8 sps:$4 sm:$0xff]   ;;  %v834_v21 = vld [vmem:[#allocation7 + $0x70] ss:$8 sps:$4 sm:$0xff]   ;;  %v835_v22 = vld [vmem:[#allocation7 + $0x84] ss:$8 sps:$4 sm:$0xff]  }
  0x51   :  { %392 = vmatpush1.bf16.msra.mxu1 %v816_v9  ;;  %v837_v23 = vld [vmem:[#allocation7 + $0x80] ss:$8 sps:$4 sm:$0xff]   ;;  %v838_v24 = vld [vmem:[#allocation7 + $0x94] ss:$8 sps:$4 sm:$0xff]   ;;  %v840_v25 = vld [vmem:[#allocation7 + $0x90] ss:$8 sps:$4 sm:$0xff]  }
  0x52   :  { %730 = vmatmul.mubr.msk.bf16.vlgmr.msra.gmra.mrb[0].mxu0 %vm132_vm0, %v810_v8  ;;  %393 = vmatprep.subr.bf16.mxu1 %v817_v10  ;;  %v841_v26 = vld [vmem:[#allocation7 + $0xa4] ss:$8 sps:$4 sm:$0xff]   ;;  %v843_v27 = vld [vmem:[#allocation7 + $0xa0] ss:$8 sps:$4 sm:$0xff]   ;;  %v844_v28 = vld [vmem:[#allocation7 + $0xb4] ss:$8 sps:$4 sm:$0xff]  }
  0x53   :  { %v846_v29 = vld [vmem:[#allocation7 + $0xb0] ss:$8 sps:$4 sm:$0xff]   ;;  %v847_v30 = vld [vmem:[#allocation7 + $0xc4] ss:$8 sps:$4 sm:$0xff]   ;;  %v849_v31 = vld [vmem:[#allocation7 + $0xc0] ss:$8 sps:$4 sm:$0xff]  }
  0x54   :  { %v850_v32 = vld [vmem:[#allocation7 + $0xd4] ss:$8 sps:$4 sm:$0xff]   ;;  %v852_v33 = vld [vmem:[#allocation7 + $0xd0] ss:$8 sps:$4 sm:$0xff]   ;;  %v853_v34 = vld [vmem:[#allocation7 + $0xe4] ss:$8 sps:$4 sm:$0xff]  }
  0x55   :  { %394 = vmatpush1.bf16.msra.mxu1 %v819_v11  ;;  %v855_v35 = vld [vmem:[#allocation7 + $0xe0] ss:$8 sps:$4 sm:$0xff]   ;;  %v856_v36 = vld [vmem:[#allocation7 + $0xf4] ss:$8 sps:$4 sm:$0xff]   ;;  %v858_v37 = vld [vmem:[#allocation7 + $0xf0] ss:$8 sps:$4 sm:$0xff]  }
  0x56   :  { %395 = vmatprep.subr.bf16.mxu1 %v820_v12  ;;  %v859_v38 = vld [vmem:[#allocation8] ss:$8 sps:$4 sm:$0xff]   ;;  %v861_v39 = vld [vmem:[#allocation8 + $0x4] ss:$8 sps:$4 sm:$0xff]   ;;  %v864_v40 = vld [vmem:[#allocation8 + $0x14] ss:$8 sps:$4 sm:$0xff]  }
  0x57   :  { %642 = vmatprep.subr.bf16.mxu0 %v861_v39  ;;  %v862_v41 = vld [vmem:[#allocation8 + $0x10] ss:$8 sps:$4 sm:$0xff]   ;;  %v867_v42 = vld [vmem:[#allocation8 + $0x24] ss:$8 sps:$4 sm:$0xff]   ;;  %v865_v43 = vld [vmem:[#allocation8 + $0x20] ss:$8 sps:$4 sm:$0xff]  }
  0x58   :  { %643 = vmatpush1.bf16.msra.mxu0 %v859_v38  ;;  %v870_v44 = vld [vmem:[#allocation8 + $0x34] ss:$8 sps:$4 sm:$0xff]   ;;  %v868_v45 = vld [vmem:[#allocation8 + $0x30] ss:$8 sps:$4 sm:$0xff]   ;;  %v873_v46 = vld [vmem:[#allocation8 + $0x44] ss:$8 sps:$4 sm:$0xff]  }
  0x59   :  { %396 = vmatpush1.bf16.msra.mxu1 %v822_v13  ;;  %644 = vmatprep.subr.bf16.mxu0 %v864_v40  ;;  %v871_v47 = vld [vmem:[#allocation8 + $0x40] ss:$8 sps:$4 sm:$0xff]   ;;  %v876_v48 = vld [vmem:[#allocation8 + $0x54] ss:$8 sps:$4 sm:$0xff]   ;;  %v874_v49 = vld [vmem:[#allocation8 + $0x50] ss:$8 sps:$4 sm:$0xff]  }
  0x5a   :  { %397 = vmatprep.subr.bf16.mxu1 %v823_v14  ;;  %v879_v50 = vld [vmem:[#allocation8 + $0x64] ss:$8 sps:$4 sm:$0xff]   ;;  %v877_v51 = vld [vmem:[#allocation8 + $0x60] ss:$8 sps:$4 sm:$0xff]   ;;  %v882_v52 = vld [vmem:[#allocation8 + $0x74] ss:$8 sps:$4 sm:$0xff]  }
  0x5b   :  { %v880_v53 = vld [vmem:[#allocation8 + $0x70] ss:$8 sps:$4 sm:$0xff]   ;;  %v885_v54 = vld [vmem:[#allocation8 + $0x84] ss:$8 sps:$4 sm:$0xff]   ;;  %v883_v55 = vld [vmem:[#allocation8 + $0x80] ss:$8 sps:$4 sm:$0xff]  }
  0x5c   :  { %645 = vmatpush1.bf16.msra.mxu0 %v862_v41  ;;  %v888_v56 = vld [vmem:[#allocation8 + $0x94] ss:$8 sps:$4 sm:$0xff]   ;;  %v886_v57 = vld [vmem:[#allocation8 + $0x90] ss:$8 sps:$4 sm:$0xff]   ;;  %v891_v58 = vld [vmem:[#allocation8 + $0xa4] ss:$8 sps:$4 sm:$0xff]  }
  0x5d   :  { %398 = vmatpush1.bf16.msra.mxu1 %v825_v15  ;;  %646 = vmatprep.subr.bf16.mxu0 %v867_v42  ;;  %v889_v59 = vld [vmem:[#allocation8 + $0xa0] ss:$8 sps:$4 sm:$0xff]   ;;  %v894_v60 = vld [vmem:[#allocation8 + $0xb4] ss:$8 sps:$4 sm:$0xff]   ;;  %v892_v61 = vld [vmem:[#allocation8 + $0xb0] ss:$8 sps:$4 sm:$0xff]  }
  0x5e   :  { %399 = vmatprep.subr.bf16.mxu1 %v826_v16  ;;  %v897_v62 = vld [vmem:[#allocation8 + $0xc4] ss:$8 sps:$4 sm:$0xff]   ;;  %v895_v63 = vld [vmem:[#allocation8 + $0xc0] ss:$8 sps:$4 sm:$0xff]   ;;  %v900_v0 = vld [vmem:[#allocation8 + $0xd4] ss:$8 sps:$4 sm:$0xff]  }
  0x5f   :  { %v898_v1 = vld [vmem:[#allocation8 + $0xd0] ss:$8 sps:$4 sm:$0xff]   ;;  %v98_v3 = vshrl.u32 %v97_v2, 7 }
  0x60   :  { %647 = vmatpush1.bf16.msra.mxu0 %v865_v43  ;;  %v95_v5 = vld [vmem:[%s1147_s2] sm:$0x3] }
  0x61   :  { %400 = vmatpush1.bf16.msra.mxu1 %v828_v17  ;;  %648 = vmatprep.subr.bf16.mxu0 %v870_v44  ;;  %v99_v4 = vsub.s32 0, %v98_v3  ;;  %v103_v6 = vsub.s32 1, %v98_v3  ;;  %v470_v44 = vld [vmem:[%s1151_s6] sm:$0x3] }
  0x62   :  { %401 = vmatprep.subr.bf16.mxu1 %v829_v18 }
  0x63   :  { %v100_v7 = vrot.slane %v95_v5, %v99_v4  ;;  %v104_v8 = vrot.slane %v95_v5, %v103_v6 }
  0x64   :  { %649 = vmatpush1.bf16.msra.mxu0 %v868_v45  ;;  %v475_v45 = vrot.slane %v470_v44, %v99_v4 }
  0x65   :  { %402 = vmatpush1.bf16.msra.mxu1 %v831_v19  ;;  %650 = vmatprep.subr.bf16.mxu0 %v873_v46  ;;  %v479_v46 = vrot.slane %v470_v44, %v103_v6 }
  0x66   :  { %403 = vmatprep.subr.bf16.mxu1 %v832_v20 }
  0x68   :  { %651 = vmatpush1.bf16.msra.mxu0 %v871_v47  ;;  %v689_v47 = vld [vmem:[%s1152_s7] sm:$0x3] }
  0x69   :  { %404 = vmatpush1.bf16.msra.mxu1 %v834_v21  ;;  %652 = vmatprep.subr.bf16.mxu0 %v876_v48 }
  0x6a   :  { %405 = vmatprep.subr.bf16.mxu1 %v835_v22 }
  0x6c   :  { %653 = vmatpush1.bf16.msra.mxu0 %v874_v49 }
  0x6d   :  { %406 = vmatpush1.bf16.msra.mxu1 %v837_v23  ;;  %654 = vmatprep.subr.bf16.mxu0 %v879_v50  ;;  %v903_v23 = vld [vmem:[#allocation8 + $0xe4] ss:$8 sps:$4 sm:$0xff]  }
  0x6e   :  { %407 = vmatprep.subr.bf16.mxu1 %v838_v24  ;;  %v901_v24 = vld [vmem:[#allocation8 + $0xe0] ss:$8 sps:$4 sm:$0xff]  }
  0x70   :  { %655 = vmatpush1.bf16.msra.mxu0 %v877_v51  ;;  %v694_v51 = vrot.slane %v689_v47, %v99_v4 }
  0x71   :  { %408 = vmatpush1.bf16.msra.mxu1 %v840_v25  ;;  %656 = vmatprep.subr.bf16.mxu0 %v882_v52  ;;  %v906_v25 = vld [vmem:[#allocation8 + $0xf4] ss:$8 sps:$4 sm:$0xff]  }
  0x72   :  { %409 = vmatprep.subr.bf16.mxu1 %v841_v26  ;;  %v904_v26 = vld [vmem:[#allocation8 + $0xf0] ss:$8 sps:$4 sm:$0xff]  }
  0x74   :  { %657 = vmatpush1.bf16.msra.mxu0 %v880_v53 }
  0x75   :  { %410 = vmatpush1.bf16.msra.mxu1 %v843_v27  ;;  %658 = vmatprep.subr.bf16.mxu0 %v885_v54  ;;  %v217_v27 = vld [vmem:[%s1149_s4] sm:$0x3]  ;;  %v698_v54 = vrot.slane %v689_v47, %v103_v6 }
  0x76   :  { %411 = vmatprep.subr.bf16.mxu1 %v844_v28  ;;  %v222_v28 = vrot.slane %v217_v27, %v99_v4  ;;  %v712_v4 = vstv %s1153_s8 }
  0x78   :  { %659 = vmatpush1.bf16.msra.mxu0 %v883_v55 }
  0x79   :  { %412 = vmatpush1.bf16.msra.mxu1 %v846_v29  ;;  %660 = vmatprep.subr.bf16.mxu0 %v888_v56  ;;  %v226_v29 = vrot.slane %v217_v27, %v103_v6 }
  0x7a   :  { %413 = vmatprep.subr.bf16.mxu1 %v847_v30 }
  0x7c   :  { %661 = vmatpush1.bf16.msra.mxu0 %v886_v57 }
  0x7d   :  { %414 = vmatpush1.bf16.msra.mxu1 %v849_v31  ;;  %662 = vmatprep.subr.bf16.mxu0 %v891_v58 }
  0x7e   :  { %415 = vmatprep.subr.bf16.mxu1 %v850_v32 }
  0x80   :  { %663 = vmatpush1.bf16.msra.mxu0 %v889_v59 }
  0x81   :  { %416 = vmatpush1.bf16.msra.mxu1 %v852_v33  ;;  %664 = vmatprep.subr.bf16.mxu0 %v894_v60 }
  0x82   :  { %417 = vmatprep.subr.bf16.mxu1 %v853_v34 }
  0x84   :  { %665 = vmatpush1.bf16.msra.mxu0 %v892_v61 }
  0x85   :  { %418 = vmatpush1.bf16.msra.mxu1 %v855_v35  ;;  %666 = vmatprep.subr.bf16.mxu0 %v897_v62 }
  0x86   :  { %419 = vmatprep.subr.bf16.mxu1 %v856_v36 }
  0x88   :  { %667 = vmatpush1.bf16.msra.mxu0 %v895_v63 }
  0x89   :  { %420 = vmatpush1.bf16.msra.mxu1 %v858_v37  ;;  %668 = vmatprep.subr.bf16.mxu0 %v900_v0 }
  0x8c   :  { %669 = vmatpush1.bf16.msra.mxu0 %v898_v1 }
  0x8d   :  { %670 = vmatprep.subr.bf16.mxu0 %v903_v23 }
  0x90   :  { %671 = vmatpush1.bf16.msra.mxu0 %v901_v24 }
  0x91   :  { %672 = vmatprep.subr.bf16.mxu0 %v906_v25 }
  0x94   :  { %673 = vmatpush1.bf16.msra.mxu0 %v904_v26 }
 0x125   :  { %v170_v9 = vpop.f32.mrb[0].mxu0 }
 0x126   :  { %v171_v10 = vadd.f32 %v170_v9, %v100_v7  ;;  %v172_v11 = vpop.f32.mrb[1].mxu0 }
 0x127   :  { %v173_v12 = vadd.f32 %v172_v11, %v104_v8  ;;  %v174_v13 = vpop.f32.mrb[2].mxu0 }
 0x128   :  { %v175_v14 = vadd.f32 %v174_v13, %v100_v7  ;;  %v176_v15 = vpop.f32.mrb[3].mxu0  ;;  %v179_v17 = vmax.f32 %v171_v10, 0.0 }
 0x129   :  { %v177_v16 = vadd.f32 %v176_v15, %v104_v8  ;;  %v180_v19 = vmax.f32 %v173_v12, 0.0 }
 0x12a   :  { %v181_v18 = vmax.f32 %v175_v14, 0.0 }
 0x12b   :  { %v182_v20 = vmax.f32 %v177_v16, 0.0 }
 0x12c   :  { %v183_v21 = vpack.c.bf16 %v181_v18, %v179_v17 }
 0x12d   :  { %v184_v22 = vpack.c.bf16 %v182_v20, %v180_v19 }
 0x12f   :  { %421 = vmatprep.mubr.bf16.mxu1 %v184_v22 }
 0x130   :  { %422 = vmatmul.mubr.bf16.vlgmr.msra.gmra.mrb[0].mxu1 %v183_v21 }
 0x203   :  { %v423_v30 = vpop.f32.mrb[0].mxu1 }
 0x204   :  { %v424_v31 = vadd.f32 %v423_v30, %v222_v28  ;;  %v425_v32 = vpop.f32.mrb[1].mxu1 }
 0x205   :  { %v426_v33 = vadd.f32 %v425_v32, %v226_v29  ;;  %v427_v34 = vpop.f32.mrb[2].mxu1 }
 0x206   :  { %v428_v35 = vadd.f32 %v427_v34, %v222_v28  ;;  %v429_v36 = vpop.f32.mrb[3].mxu1  ;;  %v432_v38 = vmax.f32 %v424_v31, 0.0 }
 0x207   :  { %v430_v37 = vadd.f32 %v429_v36, %v226_v29  ;;  %v433_v40 = vmax.f32 %v426_v33, 0.0 }
 0x208   :  { %v434_v39 = vmax.f32 %v428_v35, 0.0 }
 0x209   :  { %v435_v41 = vmax.f32 %v430_v37, 0.0 }
 0x20a   :  { %v436_v42 = vpack.c.bf16 %v434_v39, %v432_v38 }
 0x20b   :  { %v437_v43 = vpack.c.bf16 %v435_v41, %v433_v40 }
 0x20d   :  { %674 = vmatprep.mubr.bf16.mxu0 %v437_v43 }
 0x20e   :  { %675 = vmatmul.mubr.bf16.vlgmr.msra.gmra.mrb[4].mxu0 %v436_v42 }
 0x2e1   :  { %v676_v48 = vpop.f32.mrb[4].mxu0 }
 0x2e2   :  { %v677_v49 = vadd.f32 %v676_v48, %v475_v45  ;;  %v678_v50 = vpop.f32.mrb[5].mxu0 }
 0x2e3   :  { %v679_v52 = vadd.f32 %v678_v50, %v479_v46  ;;  %v680_v53 = vpop.f32.mrb[6].mxu0 }
 0x2e4   :  { %v685_v55 = vmax.f32 %v677_v49, 0.0  ;;  %v681_v56 = vadd.f32 %v680_v53, %v475_v45  ;;  %v682_v57 = vpop.f32.mrb[7].mxu0 }
 0x2e5   :  { %v686_v58 = vmax.f32 %v679_v52, 0.0  ;;  %v683_v59 = vadd.f32 %v682_v57, %v479_v46 }
 0x2e6   :  { %v687_v60 = vmax.f32 %v681_v56, 0.0  ;;  %v701_v61 = vmul.f32 %v694_v51, %v685_v55 }
 0x2e7   :  { %v688_v62 = vmax.f32 %v683_v59, 0.0  ;;  %v702_v63 = vmul.f32 %v698_v54, %v686_v58 }
 0x2e8   :  { %v703_v0 = vmul.f32 %v694_v51, %v687_v60 }
 0x2e9   :  { %v704_v1 = vmul.f32 %v698_v54, %v688_v62  ;;  %v705_v2 = vadd.f32 %v702_v63, %v701_v61 }
 0x2eb   :  { %706 = vadd.xlane.f32.xlu0 %v705_v2  ;;  %v708_v3 = vadd.f32 %v704_v1, %v703_v0 }
 0x2ef   :  { %709 = vadd.xlane.f32.xlu0 %v708_v3 }
 0x378   :  { %v707_v5 = vpop.xlane.xlu0 %706 }
 0x379   :  { %v713_v6 = vadd.f32 %v712_v4, %v707_v5 }
 0x37b   :  { %716 = vst.msk [vmem:[%s1154_s9] sm:$0xff] %vm715_vm1, %v713_v6 }
 0x37c   :  { %v710_v7 = vpop.xlane.xlu0 %709 }
 0x37d   :  { %v714_v8 = vadd.f32 %v712_v4, %v710_v7 }
 0x37f   :  { %717 = vst.msk [vmem:[%s1154_s9 + $0x8] sm:$0xff] %vm715_vm1, %v714_v8 }
 0x380   :  { %722 = vsyncpa [#allocation4], 1 }
 0x381   :  { %723 = vsyncpa [#allocation6], 1 }
 0x382   :  { %724 = vsyncpa [#allocation9], 1 }

</bundles_post_ra>
